<compile_context>
chip_gen: v7x
topology: tpu7x:2x2x1
jax: 0.10.0
libtpu: 0.0.40
codegen_flags: <defaults>
</compile_context>

<pallas_src>
import functools

import jax
import jax.numpy as jnp
from jax.experimental import pallas as pl
from jax.experimental.pallas import tpu as pltpu


def _round_up(n, m):
    return ((n + m - 1) // m) * m


def _round_down(n, m):
    return (n // m) * m


def _ssm_kernel(nx, x_ref, u_ref, w_ref, b_ref, o_ref):
    """out = x @ W[:nx] + u @ W[nx:] + b  (single f32 accumulator)."""
    # fx(x): [bm, nx] @ [nx, nx] on the MXU, f32 accumulation.
    acc = jnp.dot(x_ref[...], w_ref[:nx, :], preferred_element_type=jnp.float32)
    # fu(u): [bm, nu] @ [nu, nx], accumulated into the same value.
    acc = acc + jnp.dot(u_ref[...], w_ref[nx:, :],
                        preferred_element_type=jnp.float32)
    # Single fused bias add (bx + bu was pre-summed at param-setup time).
    o_ref[...] = (acc + b_ref[...]).astype(o_ref.dtype)


def ssm_forward(x, u, w_stacked, b, *, block_b=4096):
    """x: [B, nx], u: [B, nu], w_stacked: [nx+nu, nx] (= [Wx^T; Wu^T]),
    b: [1, nx] (= bx + bu)."""
    B, nx = x.shape
    Bu, nu = u.shape
    assert Bu == B, (B, Bu)
    assert w_stacked.shape == (nx + nu, nx), w_stacked.shape
    assert b.shape == (1, nx), b.shape

    # Batch tile: multiple of the f32 sublane tile (8).  Cap at ~half the
    # batch (rounded up to 8) so there are >= 2 grid steps whenever the batch
    # can be split -> both v7x TensorCores get work.  Never exceed the
    # (8-rounded) batch itself.
    block_b = max(8, _round_down(block_b, 8))
    half = _round_up(max((B + 1) // 2, 8), 8)
    bm = min(block_b, half, _round_up(B, 8))
    num_tiles = pl.cdiv(B, bm)

    out = pl.pallas_call(
        functools.partial(_ssm_kernel, nx),
        out_shape=jax.ShapeDtypeStruct((B, nx), x.dtype),
        grid=(num_tiles,),
        in_specs=[
            pl.BlockSpec((bm, nx), lambda i: (i, 0)),       # x tile (streamed)
            pl.BlockSpec((bm, nu), lambda i: (i, 0)),       # u tile (streamed)
            pl.BlockSpec((nx + nu, nx), lambda i: (0, 0)),  # stacked W (resident)
            pl.BlockSpec((1, nx), lambda i: (0, 0)),        # fused bias (resident)
        ],
        out_specs=pl.BlockSpec((bm, nx), lambda i: (i, 0)),
        compiler_params=pltpu.CompilerParams(
            dimension_semantics=("parallel",)),
    )(x, u, w_stacked, b)

    return out


def reference_forward(x, u, wx_t, bx, wu_t, bu):
    return x @ wx_t + bx + u @ wu_t + bu


if __name__ == "__main__":
    key = jax.random.PRNGKey(0)
    # Small shapes; B deliberately NOT a multiple of 8 to exercise the ragged
    # last block (masked edge stores) and the >=2-tile split.
    B, nx, nu = 10, 32, 16

    kx, ku, kwx, kbx, kwu, kbu = jax.random.split(key, 6)

    # Deterministic synthetic parameters (PyTorch Linear-style uniform init).
    lim_x = 1.0 / jnp.sqrt(nx)
    lim_u = 1.0 / jnp.sqrt(nu)
    wx_t = jax.random.uniform(kwx, (nx, nx), jnp.float32, -lim_x, lim_x)  # fx W^T
    bx = jax.random.uniform(kbx, (1, nx), jnp.float32, -lim_x, lim_x)     # fx bias
    wu_t = jax.random.uniform(kwu, (nu, nx), jnp.float32, -lim_u, lim_u)  # fu W^T
    bu = jax.random.uniform(kbu, (1, nx), jnp.float32, -lim_u, lim_u)     # fu bias

    # One-time parameter transform (module construction, not per call):
    # stack the transposed weights and pre-sum the biases.
    w_stacked = jnp.concatenate([wx_t, wu_t], axis=0)   # [nx+nu, nx]
    b_fused = bx + bu                                   # [1, nx]

    x = jax.random.normal(kx, (B, nx), jnp.float32)
    u = jax.random.normal(ku, (B, nu), jnp.float32)

    out = jax.block_until_ready(ssm_forward(x, u, w_stacked, b_fused))

    ref = reference_forward(x, u, wx_t, bx, wu_t, bu)
    assert out.shape == (B, nx), out.shape
    assert jnp.allclose(out, ref, atol=1e-5, rtol=1e-5), "mismatch vs reference"

    print("KERNEL_OK")
</pallas_src>

<mosaic_0001>
module attributes {stable_mosaic.version = 11 : i64} {
  func.func @_ssm_kernel(%arg0: i32, %arg1: memref<8x32xf32, #tpu.memory_space<vmem>>, %arg2: memref<8x16xf32, #tpu.memory_space<vmem>>, %arg3: memref<48x32xf32, #tpu.memory_space<vmem>>, %arg4: memref<1x32xf32, #tpu.memory_space<vmem>>, %arg5: memref<8x32xf32, #tpu.memory_space<vmem>>) attributes {dimension_semantics = [#tpu.dimension_semantics<parallel>], iteration_bounds = array<i64: 2>, scalar_prefetch = 0 : i64, scratch_operands = 0 : i64, tpu.core_type = #tpu.core_type<tc>, window_params = [{transform_indices = @transform_0, window_bounds = array<i64: 8, 32>}, {transform_indices = @transform_1, window_bounds = array<i64: 8, 16>}, {pipeline_mode = #tpu.pipeline_mode<synchronous>, transform_indices = @transform_2, window_bounds = array<i64: 48, 32>}, {pipeline_mode = #tpu.pipeline_mode<synchronous>, transform_indices = @transform_3, window_bounds = array<i64: 1, 32>}, {transform_indices = @transform_4, window_bounds = array<i64: 8, 32>}]} {
    %c0 = arith.constant 0 : index
    %c0_0 = arith.constant 0 : index
    %0 = vector.load %arg1[%c0, %c0_0] : memref<8x32xf32, #tpu.memory_space<vmem>>, vector<8x32xf32>
    %c0_1 = arith.constant 0 : index
    %c0_2 = arith.constant 0 : index
    %1 = vector.load %arg3[%c0_1, %c0_2] : memref<48x32xf32, #tpu.memory_space<vmem>>, vector<32x32xf32>
    %cst = arith.constant dense<0.000000e+00> : vector<8x32xf32>
    %2 = tpu.matmul %0, %1, %cst {dimension_numbers = #tpu.dot_dimension_numbers<[1], [0], [0], [1], [0, 0, 1, 1], [], []>} : vector<8x32xf32>, vector<32x32xf32>, vector<8x32xf32> -> vector<8x32xf32>
    %c0_3 = arith.constant 0 : index
    %c0_4 = arith.constant 0 : index
    %3 = vector.load %arg2[%c0_3, %c0_4] : memref<8x16xf32, #tpu.memory_space<vmem>>, vector<8x16xf32>
    %c32 = arith.constant 32 : index
    %c0_5 = arith.constant 0 : index
    %4 = vector.load %arg3[%c32, %c0_5] : memref<48x32xf32, #tpu.memory_space<vmem>>, vector<16x32xf32>
    %cst_6 = arith.constant dense<0.000000e+00> : vector<8x32xf32>
    %5 = tpu.matmul %3, %4, %cst_6 {dimension_numbers = #tpu.dot_dimension_numbers<[1], [0], [0], [1], [0, 0, 1, 1], [], []>} : vector<8x16xf32>, vector<16x32xf32>, vector<8x32xf32> -> vector<8x32xf32>
    %6 = arith.addf %2, %5 : vector<8x32xf32>
    %c0_7 = arith.constant 0 : index
    %c0_8 = arith.constant 0 : index
    %7 = vector.load %arg4[%c0_7, %c0_8] : memref<1x32xf32, #tpu.memory_space<vmem>>, vector<1x32xf32>
    %8 = vector.broadcast %7 : vector<1x32xf32> to vector<8x32xf32>
    %9 = arith.addf %6, %8 : vector<8x32xf32>
    %c0_9 = arith.constant 0 : index
    %c0_10 = arith.constant 0 : index
    %10 = vector.load %arg5[%c0_9, %c0_10] : memref<8x32xf32, #tpu.memory_space<vmem>>, vector<8x32xf32>
    tpu.vector_store %arg5[%c0_9, %c0_10], %9 {strides = array<i32>} : memref<8x32xf32, #tpu.memory_space<vmem>>, vector<8x32xf32>,
    return
  }
  func.func @transform_0(%arg0: i32) -> (i32, i32) {
    %c0_i32 = arith.constant 0 : i32
    %c0_i32_0 = arith.constant 0 : i32
    return %arg0, %c0_i32 : i32, i32
  }
  func.func @transform_1(%arg0: i32) -> (i32, i32) {
    %c0_i32 = arith.constant 0 : i32
    %c0_i32_0 = arith.constant 0 : i32
    return %arg0, %c0_i32 : i32, i32
  }
  func.func @transform_2(%arg0: i32) -> (i32, i32) {
    %c0_i32 = arith.constant 0 : i32
    %c0_i32_0 = arith.constant 0 : i32
    %c0_i32_1 = arith.constant 0 : i32
    return %c0_i32, %c0_i32_0 : i32, i32
  }
  func.func @transform_3(%arg0: i32) -> (i32, i32) {
    %c0_i32 = arith.constant 0 : i32
    %c0_i32_0 = arith.constant 0 : i32
    %c0_i32_1 = arith.constant 0 : i32
    return %c0_i32, %c0_i32_0 : i32, i32
  }
  func.func @transform_4(%arg0: i32) -> (i32, i32) {
    %c0_i32 = arith.constant 0 : i32
    %c0_i32_0 = arith.constant 0 : i32
    return %arg0, %c0_i32 : i32, i32
  }
}

</mosaic_0001>

<bundles_post_ra>
// kernel: tpu_custom_call.1
= control target key start
LH: loop header
LB: loop body
LE: loop exit
PB: predicated region body
PF: predicated region fallthrough
CT: control target
= control target key end

     0   :  { %9 = vsyncpa [#allocation3], 0  ;;  %s770_s0 = inlined_call_operand.vmem [shape: f32[10,32], index: 0, kind: input, shape index: {}]   ;;  %s771_s1 = inlined_call_operand.vmem [shape: f32[10,16], index: 1, kind: input, shape index: {}]   ;;  %s772_s2 = inlined_call_operand.vmem [shape: f32[48,32], index: 2, kind: input, shape index: {}]   ;;  %s773_s3 = inlined_call_operand.vmem [shape: f32[1,32], index: 3, kind: input, shape index: {}]   ;;  %s774_s4 = inlined_call_operand.hbm [shape: f32[10,32], index: 4, kind: output, shape index: {}]  }
   0x1   :  { %11 = vsyncpa [#allocation3 + $0x1], 0  ;;  %s644_s15 = smov 0   ;;  %s646_s16 = smov 0  }
   0x2   :  { %s648_s17 = smov 0   ;;  %s650_s18 = smov 0  }
   0x3 LB: > { %s665_s19 = sadd.s32 4294967295, %s613_s18   ;;  %s460_s20 = sadd.s32 4294967294, %s613_s18   ;;  %s613_s18 = sphi %s650_s18, %s780_s18   ;;  %s609_s17 = sphi %s648_s17, %s779_s17   ;;  %s605_s16 = sphi %s646_s16, %s778_s16   ;;  %s601_s15 = sphi %s644_s15, %s777_s15  }
   0x4   : > { %s669_s21 = sadd.s32 1, %s613_s18   ;;  %s118_s22 = sadd.s32 1, %s609_s17 }
   0x5   : > { %s115_s23 = ssub.s32 %s613_s18, %s669_s21  ;;  %p128_p0 = scmp.ne.s32.totalorder %s609_s17, %s605_s16 }
   0x6   : > { %p116_p1 = scmp.eq.s32.totalorder %s115_s23, 0  ;;  %p129_p2 = scmp.eq.s32.totalorder %s665_s19, 1 }
   0x7   : > { %p134_p3 = scmp.ne.s32.totalorder %s605_s16, %s601_s15  ;;  %p135_p4 = scmp.eq.s32.totalorder %s460_s20, 1 }
   0x8   : > { %s680_s24 = scalar_select %p116_p1, %s609_s17, %s118_s22  }
   0x9   : > { %p682_p5 = por %p129_p2, %p128_p0  ;;  %p686_p6 = por %p135_p4, %p134_p3 }
   0xa   : > { %p463_p7 = scmp.ge.s32.totalorder %s613_s18, 1  ;;  %p173_p8 = scmp.lt.s32.totalorder %s613_s18, 3 }
   0xc   : > { %p174_p9 = pnand %p463_p7, %p173_p8 }
   0xd   : > { %v211_v0 = vld [vmem:[%s772_s2] sm:$0xff] (!%p174_p9)  ;;  %v212_v1 = vld [vmem:[%s772_s2 + $0x8] sm:$0xff] (!%p174_p9)  ;;  %v615_v3 = vmov (!%p174_p9), 0.0|0.0   ;;  %v213_v6 = vld [vmem:[%s772_s2 + $0x10] sm:$0xff] (!%p174_p9)  ;;  %p202_p10 = scmp.lt.s32.totalorder (!%p174_p9), %s665_s19, 1  ;;  %vm616_vm0 = vmmov (!%p174_p9), 0  }
   0xe   : > { %177 = sbr.rel (%p174_p9) target bundleno = 257 (0x101), region = 36  ;;  %v216_v2 = vld [vmem:[%s772_s2 + $0x20] sm:$0xff] (!%p174_p9)  ;;  %503 = vmatprep.subr.bf16.mxu1 (!%p174_p9), %v615_v3  ;;  %v504_v4 = vpack.c.bf16 (!%p174_p9), %v212_v1, %v211_v0  ;;  %500 = vmatprep.subr.bf16.mxu0 (!%p174_p9), %v615_v3  ;;  %v217_v5 = vld [vmem:[%s772_s2 + $0x28] sm:$0xff] (!%p174_p9)  ;;  %v214_v7 = vld [vmem:[%s772_s2 + $0x18] sm:$0xff] (!%p174_p9)  ;;  %v617_v9 = vmov (!%p174_p9), 0.0   ;;  %vm218_vm1 = vcmask (!%p174_p9), 130048  }
   0xf   : > { %v501_v8 = vpack.c.bf16 (!%p174_p9), %v217_v5, %v216_v2  ;;  %486 = vmatprep.mubr.msk.f32.mxu0 (!%p174_p9), %vm616_vm0, %v617_v9  ;;  %497 = vmatprep.mubr.msk.f32.mxu1 (!%p174_p9), %vm616_vm0, %v617_v9  ;;  %v507_v10 = vpack.c.bf16 (!%p174_p9), %v214_v7, %v213_v6  ;;  %vm292_vm2 = vcmask (!%p174_p9), 261120   ;;  %s199_s30 = sand.u32 (!%p174_p9), 1, %s605_s16   ;;  %v469_v16 = vld [vmem:[%s773_s3] ss:$0 sm:$0xff] (!%p174_p9)  ;;  %s471_s8 = sshll.u32 (!%p174_p9), %s665_s19, 7 }
  0x10   : > { %505 = vmatpush3.bf16.msra.mxu1 (!%p174_p9), %v504_v4  ;;  %s464_s5 = sshll.u32 (!%p174_p9), %s199_s30, 3 }
  0x11   : > { %502 = vmatpush3.bf16.msra.mxu0 (!%p174_p9), %v501_v8  ;;  %506 = vmatprep.subr.bf16.mxu1 (!%p174_p9), %v615_v3  ;;  %s201_s9 = scalar_lea.vmem (!%p174_p9), [#allocation2], %s464_s5 }
  0x12   : > { %s389_s10 = sshll.u32 (!%p174_p9), %s201_s9, 4  ;;  %s729_s10 = int_to_ptr.vmem [resolvable:$true] %s389_s10 }
  0x13   : > { %s551_s20 = scalar_lea.vmem (!%p174_p9), %s729_s10, 128 }
  0x14   : > { %508 = vmatpush3.bf16.msra.mxu1 (!%p174_p9), %v507_v10  ;;  %p552_p11 = scmp.ne.s32.totalorder (!%p174_p9), %s729_s10, %s551_s20 }
  0x15   : > { %s203_s13 = scalar_select %p202_p10, %s665_s19, 1 }
  0x16   : > { %p553_p12 = pnand %p552_p11, %p682_p5  ;;  %s618_s19 = smov [#allocation2]  }
  0x17   : > { %s465_s14 = sshll.u32 %s203_s13, 3  ;;  %s727_s13 = scalar_lea.hbm %s774_s4, %s471_s8 }
  0x18   : > { %s209_s23 = scalar_lea.vmem %s771_s1, %s465_s14  ;;  %s205_s29 = scalar_lea.vmem %s770_s0, %s465_s14 }
  0x19   : > { %v215_v11 = vld [vmem:[%s209_s23] sm:$0xff]  ;;  %s376_s14 = scalar_lea.sflag [#allocation3], %s199_s30  ;;  %p554_p13 = pneg %p553_p12 }
  0x1a   : > { %v210_v12 = vld [vmem:[%s205_s29] sm:$0xff]  ;;  %487 = vmatmul.mubr.msk.f32.vlgmr.msra.gmra.mrb[0].mxu0 %vm218_vm1, %v215_v11  ;;  %s555_s22 = sshll.u32 %s618_s19, 4  ;;  %s556_s22 = int_to_ptr.vmem [resolvable:$false] %s555_s22 }
  0x1b   : > { %498 = vmatmul.mubr.msk.f32.vlgmr.msra.gmra.mrb[0].mxu1 %vm292_vm2, %v210_v12  ;;  %s557_s23 = scalar_lea.vmem %s556_s22, 256  ;;  %p558_p0 = scmp.lt.s32.totalorder %s729_s10, %s556_s22 }
  0x1c   : > { %p559_p1 = scmp.lt.s32.totalorder %s557_s23, %s551_s20 }
  0x1e   : > { %p560_p2 = por %p559_p1, %p558_p0 }
  0x20   : > { %p561_p3 = pnand %p560_p2, %p554_p13 }
  0xed   : > { %v288_v13 = vpop.f32.mrb[0].mxu0 }
  0xee   : > { %v488_v14 = vpop.f32.mrb[1].mxu0  ;;  %v362_v15 = vpop.f32.mrb[0].mxu1 }
  0xef   : > { %v363_v17 = vadd.f32 %v362_v15, %v288_v13  ;;  %v499_v18 = vpop.f32.mrb[1].mxu1 }
  0xf1   : > { %v373_v19 = vadd.f32 %v469_v16, %v363_v17 }
  0xf3   : > { %374 = vst.msk [vmem:[%s201_s9] sm:$0xff] %vm292_vm2, %v373_v19 }
  0xf4   : > { %564 = shalt.err (!%p561_p3)
}
  0xf5   : > { %s565_s27 = scalar_lea.hbm %s727_s13, 128  ;;  %s569_s30 = scalar_lea.hbm %s774_s4, 256 }
  0xf6   : > { %p566_p4 = scmp.ne.s32.totalorder %s727_s13, %s565_s27  ;;  %p570_p9 = scmp.lt.u32.totalorder %s727_s13, %s774_s4 }
  0xf7   : > { %p571_p10 = scmp.lt.u32.totalorder %s569_s30, %s565_s27  ;;  %p573_p12 = scmp.lt.u32.totalorder %s565_s27, %s727_s13 }
  0xf8   : > { %p567_p7 = pnand %p566_p4, %p682_p5 }
  0xf9   : > { %p572_p11 = por %p571_p10, %p570_p9 }
  0xfa   : > { %p568_p8 = pneg %p567_p7 }
  0xfb   : > { %p574_p13 = por %p573_p12, %p572_p11 }
  0xfd   : > { %p575_p0 = pnand %p574_p13, %p568_p8 }
  0xff   : > { %578 = shalt.err (!%p575_p0)
}
 0x100   : > { %509 = dma.vmem_to_hbm [thread:$0]  (%p682_p5), %s729_s10, 128, %s727_s13, %s376_s14  }
 0x101 PF: > { %p515_p1 = scmp.ge.s32.totalorder %s613_s18, 2  ;;  %s401_s7 = sand.u32 1, %s601_s15  }
 0x102   : > { %s402_s8 = scalar_lea.sflag [#allocation3], %s401_s7 }
 0x103   : > { %p512_p2 = pnand %p515_p1, %p686_p6 }
 0x105   : > { %596 = dma.done.wait (!%p512_p2), %s402_s8, 128  }
 0x106   : > { %598 = vsyncadd (!%p512_p2), %s402_s8, 4294967168  ;;  %p14_p3 = scmp.ge.s32.totalorder %s669_s21, 4   ;;  %s777_s15 = smov %s605_s16 }
 0x107   : > { %s778_s16 = smov %s609_s17  ;;  %s779_s17 = smov %s680_s24 }
 0x108   : > { %s780_s18 = smov %s669_s21  ;;  %16 = sbr.rel (!%p14_p3) target bundleno = 3 (0x3), region = 74 }
 0x10f   :  { %407 = vsyncpa [#allocation3], 1 }
 0x110   :  { %409 = vsyncpa [#allocation3 + $0x1], 1 }

</bundles_post_ra>
